<compile_context>
chip_gen: v6e
topology: v6e:2x2x1
jax: 0.10.0
libtpu: 0.0.40
codegen_flags: <defaults>
</compile_context>

<pallas_src>
import functools

import jax
import jax.numpy as jnp
from jax.experimental import pallas as pl
from jax.experimental.pallas import tpu as pltpu


# ------------------------------ kernels ------------------------------------


def _se_fused_kernel(x_ref, w1_ref, b1_ref, w2_ref, b2_ref, o_ref, *, inv_hw):
    # x_ref: (C, HWp)   w1_ref: (Ch, C)  b1_ref: (Ch, 1)
    # w2_ref: (C, Ch)   b2_ref: (C, 1)   o_ref: (C, HWp)

    # Global average pool over the (padded) spatial lanes; padded lanes are
    # zero, so sum * 1/(H*W) over the true extent is exact.
    pooled = jnp.sum(x_ref[...].astype(jnp.float32), axis=-1,
                     keepdims=True) * inv_hw                           # (C, 1)

    # conv1 (1x1) == matvec + ReLU ; conv2 (1x1) == matvec + sigmoid.
    h = jnp.dot(w1_ref[...], pooled,
                preferred_element_type=jnp.float32) + b1_ref[...]      # (Ch, 1)
    h = jnp.maximum(h, 0.0)
    s = jnp.dot(w2_ref[...], h,
                preferred_element_type=jnp.float32) + b2_ref[...]      # (C, 1)
    s = jax.nn.sigmoid(s)

    # Re-read the slab from VMEM for the scale (cheap vlds) instead of keeping
    # the earlier load live across the whole FC chain.  Multiply in the input
    # dtype so bf16 I/O stays bf16 on the VPU/store path (v6e/v7x).
    o_ref[...] = (x_ref[...] * s.astype(x_ref.dtype)).astype(o_ref.dtype)


def _se_scale_kernel(x_ref, s_ref, o_ref):
    # x_ref: (tc, thw)  s_ref: (tc, 1)  o_ref: (tc, thw)
    o_ref[...] = (x_ref[...] * s_ref[...].astype(x_ref.dtype)).astype(o_ref.dtype)


# ------------------------------ wrappers ------------------------------------


def _pad_hw(x2, hw):
    """Zero-pad the last (lane) dim up to a multiple of 128 for dense stores."""
    hwp = ((hw + 127) // 128) * 128
    if hwp != hw:
        x2 = jnp.pad(x2, ((0, 0), (0, 0), (0, hwp - hw)))
    return x2, hwp


def _largest_tile(dim, unit, cap):
    """Largest multiple of `unit` that divides `dim` and is <= cap; else full dim."""
    best = None
    d = unit
    while d <= min(dim, cap):
        if dim % d == 0:
            best = d
        d += unit
    return best if best is not None else dim


def selayer_forward_fused(x, w1, b1, w2, b2):
    """Fused pool->FC->scale.  x: (N,C,H,W); w1: (Ch,C); b1: (Ch,); w2: (C,Ch); b2: (C,)."""
    N, C, H, W = x.shape
    HW = H * W
    Ch = w1.shape[0]

    x2, HWp = _pad_hw(x.reshape(N, C, HW), HW)
    w1f = w1.astype(jnp.float32)
    w2f = w2.astype(jnp.float32)
    b1c = b1.reshape(Ch, 1).astype(jnp.float32)
    b2c = b2.reshape(C, 1).astype(jnp.float32)

    itemsize = jnp.dtype(x.dtype).itemsize
    slab = C * HWp * itemsize
    # Double-buffered in + out slabs, plus (grid-invariant) weights and margin.
    vmem_est = 4 * slab + 4 * (w1f.size + w2f.size + Ch + C) + (2 << 20)
    cparams = dict(dimension_semantics=("parallel",))
    if vmem_est > (32 << 20):
        # Re-derive the budget for v7x's 64 MiB physical VMEM (keep headroom).
        # TODO(synk): if even this overflows, fall back to selayer_forward_two_pass.
        cparams["vmem_limit_bytes"] = min(vmem_est, 56 << 20)

    cost = pl.CostEstimate(
        flops=2 * N * C * HW + 4 * N * Ch * C,
        transcendentals=N * C,
        bytes_accessed=2 * N * C * HW * itemsize,
    )

    out = pl.pallas_call(
        functools.partial(_se_fused_kernel, inv_hw=1.0 / float(HW)),
        out_shape=jax.ShapeDtypeStruct((N, C, HWp), x.dtype),
        grid_spec=pltpu.PrefetchScalarGridSpec(
            num_scalar_prefetch=0,
            grid=(N,),
            in_specs=[
                pl.BlockSpec((pl.Squeezed(), C, HWp), lambda b: (b, 0, 0)),
                # Weights/biases are grid-invariant (constant index_map), so
                # the pipeline keeps them resident and never re-DMAs them.
                pl.BlockSpec((Ch, C), lambda b: (0, 0)),
                pl.BlockSpec((Ch, 1), lambda b: (0, 0)),
                pl.BlockSpec((C, Ch), lambda b: (0, 0)),
                pl.BlockSpec((C, 1), lambda b: (0, 0)),
            ],
            out_specs=pl.BlockSpec((pl.Squeezed(), C, HWp), lambda b: (b, 0, 0)),
        ),
        compiler_params=pltpu.CompilerParams(**cparams),
        cost_estimate=cost,
    )(x2, w1f, b1c, w2f, b2c)

    return out[..., :HW].reshape(N, C, H, W)


def selayer_forward_two_pass(x, w1, b1, w2, b2, *, tc_cap=256, thw_cap=1024):
    """Pool/FCs in plain XLA (tiny), channel scale in a fully-parallel Pallas kernel.

    Preferred for small N (<= 2-4), where the fused grid=(N,) cannot pipeline
    or feed both v7x TensorCores; costs one extra HBM read of x.
    """
    N, C, H, W = x.shape
    HW = H * W

    # s: (N, C) in f32 -- negligible compute and traffic.
    pooled = jnp.mean(x.astype(jnp.float32), axis=(2, 3))
    h = jnp.maximum(pooled @ w1.astype(jnp.float32).T + b1.astype(jnp.float32), 0.0)
    s = jax.nn.sigmoid(h @ w2.astype(jnp.float32).T + b2.astype(jnp.float32))
    s3 = s.reshape(N, C, 1)

    x2, HWp = _pad_hw(x.reshape(N, C, HW), HW)
    tc = _largest_tile(C, 8, tc_cap)        # sublane-aligned channel tile
    thw = _largest_tile(HWp, 128, thw_cap)  # lane-dense spatial tile

    itemsize = jnp.dtype(x.dtype).itemsize
    cost = pl.CostEstimate(
        flops=N * C * HW,
        transcendentals=0,
        bytes_accessed=2 * N * C * HW * itemsize + N * C * 4,
    )

    out = pl.pallas_call(
        _se_scale_kernel,
        out_shape=jax.ShapeDtypeStruct((N, C, HWp), x.dtype),
        grid_spec=pltpu.PrefetchScalarGridSpec(
            num_scalar_prefetch=0,
            grid=(N, C // tc, HWp // thw),
            in_specs=[
                pl.BlockSpec((pl.Squeezed(), tc, thw), lambda b, ci, hi: (b, ci, hi)),
                pl.BlockSpec((pl.Squeezed(), tc, 1), lambda b, ci, hi: (b, ci, 0)),
            ],
            out_specs=pl.BlockSpec((pl.Squeezed(), tc, thw), lambda b, ci, hi: (b, ci, hi)),
        ),
        compiler_params=pltpu.CompilerParams(
            dimension_semantics=("parallel", "parallel", "parallel")),
        cost_estimate=cost,
    )(x2, s3)

    return out[..., :HW].reshape(N, C, H, W)


def selayer_forward(x, w1, b1, w2, b2):
    """Dispatch: two-pass for tiny batches (pipelining / 2-TC utilization), fused otherwise."""
    if x.shape[0] <= 2:
        return selayer_forward_two_pass(x, w1, b1, w2, b2)
    return selayer_forward_fused(x, w1, b1, w2, b2)


def selayer_ref(x, w1, b1, w2, b2):
    """Pure-JAX reference mirroring the PyTorch forward."""
    pooled = jnp.mean(x, axis=(2, 3))                    # (N, C)
    h = jnp.maximum(pooled @ w1.T + b1, 0.0)             # (N, C//16)
    s = jax.nn.sigmoid(h @ w2.T + b2)                    # (N, C)
    return x * s[:, :, None, None]


if __name__ == "__main__":
    key = jax.random.PRNGKey(0)

    # One lane-aligned case (HW = 256) and one exercising the pad-to-128 path
    # (HW = 100).  inplanes must be >= 16 for the //16 squeeze.
    for (N, C, H, W) in [(2, 64, 16, 16), (2, 32, 10, 10)]:
        Ch = C // 16
        key, kx, k1, k2, k3, k4 = jax.random.split(key, 6)
        x = jax.random.normal(kx, (N, C, H, W), dtype=jnp.float32)
        w1 = jax.random.normal(k1, (Ch, C), dtype=jnp.float32) * 0.1   # conv1.weight (Ch,C,1,1)
        b1 = jax.random.normal(k2, (Ch,), dtype=jnp.float32) * 0.1     # conv1.bias
        w2 = jax.random.normal(k3, (C, Ch), dtype=jnp.float32) * 0.1   # conv2.weight (C,Ch,1,1)
        b2 = jax.random.normal(k4, (C,), dtype=jnp.float32) * 0.1      # conv2.bias

        ref = selayer_ref(x, w1, b1, w2, b2)

        out_fused = jax.block_until_ready(selayer_forward_fused(x, w1, b1, w2, b2))
        out_two = jax.block_until_ready(selayer_forward_two_pass(x, w1, b1, w2, b2))

        assert out_fused.shape == (N, C, H, W)
        assert out_two.shape == (N, C, H, W)
        assert jnp.allclose(out_fused, ref, atol=1e-5, rtol=1e-5), "fused mismatch"
        assert jnp.allclose(out_two, ref, atol=1e-5, rtol=1e-5), "two-pass mismatch"

    print("KERNEL_OK")
</pallas_src>

<mosaic_0001>
module attributes {stable_mosaic.version = 11 : i64} {
  func.func @_se_fused_kernel(%arg0: i32, %arg1: memref<1x64x256xf32, #tpu.memory_space<vmem>>, %arg2: memref<4x64xf32, #tpu.memory_space<vmem>>, %arg3: memref<4x1xf32, #tpu.memory_space<vmem>>, %arg4: memref<64x4xf32, #tpu.memory_space<vmem>>, %arg5: memref<64x1xf32, #tpu.memory_space<vmem>>, %arg6: memref<1x64x256xf32, #tpu.memory_space<vmem>>) attributes {dimension_semantics = [#tpu.dimension_semantics<parallel>], iteration_bounds = array<i64: 2>, scalar_prefetch = 0 : i64, scratch_operands = 0 : i64, tpu.core_type = #tpu.core_type<tc>, window_params = [{transform_indices = @transform_0, window_bounds = array<i64: 1, 64, 256>}, {pipeline_mode = #tpu.pipeline_mode<synchronous>, transform_indices = @transform_1, window_bounds = array<i64: 4, 64>}, {pipeline_mode = #tpu.pipeline_mode<synchronous>, transform_indices = @transform_2, window_bounds = array<i64: 4, 1>}, {pipeline_mode = #tpu.pipeline_mode<synchronous>, transform_indices = @transform_3, window_bounds = array<i64: 64, 4>}, {pipeline_mode = #tpu.pipeline_mode<synchronous>, transform_indices = @transform_4, window_bounds = array<i64: 64, 1>}, {transform_indices = @transform_5, window_bounds = array<i64: 1, 64, 256>}]} {
    %c0 = arith.constant 0 : index
    %c0_0 = arith.constant 0 : index
    %c0_1 = arith.constant 0 : index
    %0 = vector.load %arg1[%c0, %c0_0, %c0_1] : memref<1x64x256xf32, #tpu.memory_space<vmem>>, vector<1x64x256xf32>
    %1 = vector.shape_cast %0 : vector<1x64x256xf32> to vector<64x256xf32>
    %cst = arith.constant dense<0.000000e+00> : vector<64xf32>
    %2 = vector.multi_reduction <add>, %1, %cst [1] : vector<64x256xf32> to vector<64xf32>
    %3 = vector.shape_cast %2 : vector<64xf32> to vector<64x1xf32>
    %cst_2 = arith.constant 3.906250e-03 : f32
    %4 = vector.broadcast %cst_2 : f32 to vector<64x1xf32>
    %5 = arith.mulf %3, %4 : vector<64x1xf32>
    %c0_3 = arith.constant 0 : index
    %c0_4 = arith.constant 0 : index
    %6 = vector.load %arg2[%c0_3, %c0_4] : memref<4x64xf32, #tpu.memory_space<vmem>>, vector<4x64xf32>
    %cst_5 = arith.constant dense<0.000000e+00> : vector<4x1xf32>
    %7 = tpu.matmul %6, %5, %cst_5 {dimension_numbers = #tpu.dot_dimension_numbers<[1], [0], [0], [1], [0, 0, 1, 1], [], []>} : vector<4x64xf32>, vector<64x1xf32>, vector<4x1xf32> -> vector<4x1xf32>
    %c0_6 = arith.constant 0 : index
    %c0_7 = arith.constant 0 : index
    %8 = vector.load %arg3[%c0_6, %c0_7] : memref<4x1xf32, #tpu.memory_space<vmem>>, vector<4x1xf32>
    %9 = arith.addf %7, %8 : vector<4x1xf32>
    %cst_8 = arith.constant 0.000000e+00 : f32
    %10 = vector.broadcast %cst_8 : f32 to vector<4x1xf32>
    %11 = arith.maximumf %9, %10 : vector<4x1xf32>
    %c0_9 = arith.constant 0 : index
    %c0_10 = arith.constant 0 : index
    %12 = vector.load %arg4[%c0_9, %c0_10] : memref<64x4xf32, #tpu.memory_space<vmem>>, vector<64x4xf32>
    %cst_11 = arith.constant dense<0.000000e+00> : vector<64x1xf32>
    %13 = tpu.matmul %12, %11, %cst_11 {dimension_numbers = #tpu.dot_dimension_numbers<[1], [0], [0], [1], [0, 0, 1, 1], [], []>} : vector<64x4xf32>, vector<4x1xf32>, vector<64x1xf32> -> vector<64x1xf32>
    %c0_12 = arith.constant 0 : index
    %c0_13 = arith.constant 0 : index
    %14 = vector.load %arg5[%c0_12, %c0_13] : memref<64x1xf32, #tpu.memory_space<vmem>>, vector<64x1xf32>
    %15 = arith.addf %13, %14 : vector<64x1xf32>
    %16 = arith.negf %15 : vector<64x1xf32>
    %17 = math.exp %16 : vector<64x1xf32>
    %cst_14 = arith.constant 1.000000e+00 : f32
    %18 = vector.broadcast %cst_14 : f32 to vector<64x1xf32>
    %19 = arith.addf %18, %17 : vector<64x1xf32>
    %20 = arith.divf %18, %19 : vector<64x1xf32>
    %c0_15 = arith.constant 0 : index
    %c0_16 = arith.constant 0 : index
    %c0_17 = arith.constant 0 : index
    %21 = vector.load %arg1[%c0_15, %c0_16, %c0_17] : memref<1x64x256xf32, #tpu.memory_space<vmem>>, vector<1x64x256xf32>
    %22 = vector.shape_cast %21 : vector<1x64x256xf32> to vector<64x256xf32>
    %23 = vector.broadcast %20 : vector<64x1xf32> to vector<64x256xf32>
    %24 = arith.mulf %22, %23 : vector<64x256xf32>
    %c0_18 = arith.constant 0 : index
    %c0_19 = arith.constant 0 : index
    %c0_20 = arith.constant 0 : index
    %25 = vector.load %arg6[%c0_18, %c0_19, %c0_20] : memref<1x64x256xf32, #tpu.memory_space<vmem>>, vector<1x64x256xf32>
    %26 = vector.shape_cast %25 : vector<1x64x256xf32> to vector<64x256xf32>
    %27 = vector.shape_cast %24 : vector<64x256xf32> to vector<1x64x256xf32>
    tpu.vector_store %arg6[%c0_18, %c0_19, %c0_20], %27 {strides = array<i32>} : memref<1x64x256xf32, #tpu.memory_space<vmem>>, vector<1x64x256xf32>,
    return
  }
  func.func @transform_0(%arg0: i32) -> (i32, i32, i32) {
    %c0_i32 = arith.constant 0 : i32
    %c0_i32_0 = arith.constant 0 : i32
    %c0_i32_1 = arith.constant 0 : i32
    return %arg0, %c0_i32, %c0_i32_0 : i32, i32, i32
  }
  func.func @transform_1(%arg0: i32) -> (i32, i32) {
    %c0_i32 = arith.constant 0 : i32
    %c0_i32_0 = arith.constant 0 : i32
    %c0_i32_1 = arith.constant 0 : i32
    return %c0_i32, %c0_i32_0 : i32, i32
  }
  func.func @transform_2(%arg0: i32) -> (i32, i32) {
    %c0_i32 = arith.constant 0 : i32
    %c0_i32_0 = arith.constant 0 : i32
    %c0_i32_1 = arith.constant 0 : i32
    return %c0_i32, %c0_i32_0 : i32, i32
  }
  func.func @transform_3(%arg0: i32) -> (i32, i32) {
    %c0_i32 = arith.constant 0 : i32
    %c0_i32_0 = arith.constant 0 : i32
    %c0_i32_1 = arith.constant 0 : i32
    return %c0_i32, %c0_i32_0 : i32, i32
  }
  func.func @transform_4(%arg0: i32) -> (i32, i32) {
    %c0_i32 = arith.constant 0 : i32
    %c0_i32_0 = arith.constant 0 : i32
    %c0_i32_1 = arith.constant 0 : i32
    return %c0_i32, %c0_i32_0 : i32, i32
  }
  func.func @transform_5(%arg0: i32) -> (i32, i32, i32) {
    %c0_i32 = arith.constant 0 : i32
    %c0_i32_0 = arith.constant 0 : i32
    %c0_i32_1 = arith.constant 0 : i32
    return %arg0, %c0_i32, %c0_i32_0 : i32, i32, i32
  }
}

</mosaic_0001>

<bundles_post_ra>
// kernel: tpu_custom_call.1
= control target key start
LH: loop header
LB: loop body
LE: loop exit
PB: predicated region body
PF: predicated region fallthrough
CT: control target
= control target key end

     0   :  { %10 = vsyncpa [#allocation3], 0  ;;  %s1333_s0 = inlined_call_operand.hbm [shape: f32[2,64,256], index: 0, kind: input, shape index: {}]   ;;  %s1334_s1 = inlined_call_operand.vmem [shape: f32[4,64], index: 1, kind: input, shape index: {}]   ;;  %s1335_s2 = inlined_call_operand.vmem [shape: f32[4,1], index: 2, kind: input, shape index: {}]   ;;  %s1336_s3 = inlined_call_operand.vmem [shape: f32[64,4], index: 3, kind: input, shape index: {}]   ;;  %s1337_s4 = inlined_call_operand.vmem [shape: f32[64,1], index: 4, kind: input, shape index: {}]   ;;  %s1338_s5 = inlined_call_operand.hbm [shape: f32[2,64,256], index: 5, kind: output, shape index: {}]  }
   0x1   :  { %12 = vsyncpa [#allocation3 + $0x1], 0 }
   0x2   :  { %13 = vsyncpa [#allocation4], 0 }
   0x3   :  { %15 = vsyncpa [#allocation4 + $0x1], 0  ;;  %s1030_s18 = smov 0   ;;  %s1032_s19 = smov 0  }
   0x4   :  { %s1034_s20 = smov 0   ;;  %s1036_s21 = smov 0  }
   0x5 LB: > { %s1051_s22 = sadd.s32 4294967295, %s989_s21   ;;  %s725_s23 = sadd.s32 4294967294, %s989_s21   ;;  %s989_s21 = sphi %s1036_s21, %s1353_s21   ;;  %s985_s20 = sphi %s1034_s20, %s1352_s20   ;;  %s981_s19 = sphi %s1032_s19, %s1351_s19   ;;  %s977_s18 = sphi %s1030_s18, %s1350_s18  }
   0x6   : > { %s1055_s24 = sadd.s32 1, %s989_s21   ;;  %s28_s25 = sadd.s32 1, %s985_s20 }
   0x7   : > { %s25_s26 = ssub.s32 %s989_s21, %s1055_s24  ;;  %p35_p0 = scmp.ne.s32.totalorder %s985_s20, %s981_s19 }
   0x8   : > { %p26_p1 = scmp.eq.s32.totalorder %s25_s26, 0  ;;  %p36_p2 = scmp.eq.s32.totalorder %s989_s21, 0 }
   0x9   : > { %p41_p3 = scmp.ne.s32.totalorder %s981_s19, %s977_s18  ;;  %p42_p4 = scmp.eq.s32.totalorder %s1051_s22, 0 }
   0xa   : > { %s1067_s27 = scalar_select %p26_p1, %s985_s20, %s28_s25  }
   0xb   : > { %p1069_p5 = por %p36_p2, %p35_p0  ;;  %p1073_p6 = por %p42_p4, %p41_p3 }
   0xc   : > { %p149_p7 = scmp.eq.s32.totalorder %s1051_s22, 1  ;;  %p155_p8 = scmp.eq.s32.totalorder %s725_s23, 1 }
   0xd   : > { %s1342_s29 = scalar_select %p1073_p6, 1, 0 }
   0xe   : > { %p822_p10 = scmp.lt.s32.totalorder %s989_s21, 2  ;;  %p1080_p11 = por %p149_p7, %p35_p0 }
   0xf   : > { %p1084_p12 = por %p155_p8, %p41_p3  ;;  %s187_s7 = sand.u32 1, %s985_s20  }
  0x10   : > { %s1343_s30 = scalar_select %p1080_p11, 1, 0 }
  0x11   : > { %s1344_s6 = scalar_select %p1084_p12, 1, 0 }
  0x12   : > { %s757_s8 = sshll.u32 %s989_s21, 11  ;;  %s728_s9 = sshll.u32 %s187_s7, 7 }
  0x13   : > { %s1093_s12 = scalar_lea.hbm %s1333_s0, %s757_s8  ;;  %s191_s13 = scalar_lea.vmem [#allocation2], %s728_s9 }
  0x14   : > { %s198_s14 = sshll.u32 %s191_s13, 4  ;;  %p1097_p13 = pnand %p822_p10, %p1069_p5  ;;  %s1101_s14 = int_to_ptr.vmem [resolvable:$true] %s198_s14 }
  0x15   : > { %s1103_s16 = scalar_lea.sflag [#allocation3], %s187_s7  ;;  %s897_s17 = scalar_lea.hbm %s1093_s12, 2048 }
  0x16   : > { %p898_p0 = scmp.ne.s32.totalorder %s1093_s12, %s897_s17  ;;  %p899_p1 = pneg %p1097_p13 }
  0x17   : > { %s902_s26 = scalar_lea.hbm %s1333_s0, 4096  ;;  %p903_p4 = scmp.lt.s32.totalorder %s1093_s12, %s1333_s0 }
  0x18   : > { %p900_p2 = pnand %p899_p1, %p898_p0  ;;  %p904_p5 = scmp.lt.s32.totalorder %s902_s26, %s897_s17 }
  0x1a   : > { %p901_p3 = pneg %p900_p2  ;;  %p905_p7 = por %p904_p5, %p903_p4 }
  0x1c   : > { %p906_p8 = pnand %p905_p7, %p901_p3 }
  0x1e   : > { %909 = shalt.err (!%p906_p8)
}
  0x1f   : > { %s910_s7 = scalar_lea.vmem %s1101_s14, 2048  ;;  %s991_s9 = smov [#allocation2]  }
  0x20   : > { %p911_p10 = scmp.ne.s32.totalorder %s1101_s14, %s910_s7  ;;  %s915_s10 = sshll.u32 %s991_s9, 4  ;;  %s916_s10 = int_to_ptr.vmem [resolvable:$false] %s915_s10 }
  0x21   : > { %s917_s11 = scalar_lea.vmem %s916_s10, 4096  ;;  %p918_p2 = scmp.lt.s32.totalorder %s1101_s14, %s916_s10 }
  0x22   : > { %p913_p9 = pnand %p911_p10, %p899_p1  ;;  %p919_p12 = scmp.lt.s32.totalorder %s917_s11, %s910_s7 }
  0x24   : > { %p914_p0 = pneg %p913_p9  ;;  %p920_p11 = por %p919_p12, %p918_p2 }
  0x26   : > { %p921_p6 = pnand %p920_p11, %p914_p0 }
  0x28   : > { %924 = shalt.err (!%p921_p6)
}
  0x29   : > { %s992_s13 = smov 256   ;;  %s993_s17 = smov 16  }
  0x2a   : > { %817 = dma.hbm_to_vmem [thread:$0]  (!%p1097_p13), %s1093_s12, 2048, %s1101_s14, %s1103_s16, %s992_s13, %s992_s13, %s993_s17  }
  0x2b   : > { %p731_p9 = scmp.ge.s32.totalorder %s989_s21, 1  ;;  %p206_p1 = scmp.lt.s32.totalorder %s989_s21, 3 }
  0x2d   : > { %p207_p3 = pnand %p731_p9, %p206_p1 }
  0x2e   : > { %s1127_s23 = sand.u32 (!%p207_p3), 1, %s981_s19   ;;  %p1346_p6 = scmp.ne.s32.totalorder (!%p207_p3), %s1342_s29, 0 }
  0x2f   : > { %210 = sbr.rel (%p207_p3) target bundleno = 803 (0x323), region = 40  ;;  %s732_s25 = sshll.u32 (!%p207_p3), %s1127_s23, 7 }
  0x30   : > { %s213_s26 = scalar_lea.sflag (!%p207_p3), [#allocation3], %s1127_s23  ;;  %s216_s28 = scalar_lea.vmem (!%p207_p3), [#allocation2], %s732_s25 }
  0x34   : > { %968 = dma.done.wait (%p1346_p6), %s213_s26, 2048  }
  0x35   : > { %970 = vsyncadd (%p1346_p6), %s213_s26, 4294965248  ;;  %v1137_v0 = vld [vmem:[%s216_s28 + $0x70] sm:$0xff]  ;;  %v1139_v1 = vld [vmem:[%s216_s28 + $0x78] sm:$0xff]  ;;  %v994_v24 = vmov 0.0   ;;  %vm995_vm0 = vmmov 0   ;;  %vm293_vm1 = vcmask 523264  }
  0x36   : > { %v1141_v2 = vld [vmem:[%s216_s28 + $0x60] sm:$0xff]  ;;  %v280_v3 = vadd.f32 %v1139_v1, %v1137_v0  ;;  %v1145_v4 = vld [vmem:[%s216_s28 + $0x68] sm:$0xff]  ;;  %v1147_v5 = vld [vmem:[%s216_s28 + $0x50] sm:$0xff]  ;;  %777 = vmatprep.subr.mxu0 %v994_v24  ;;  %793 = vmatprep.mubr.msk.f32.mxu0 %vm995_vm0, %v994_v24  ;;  %vm384_vm2 = vcmask 31744   ;;  %vm409_vm3 = vcmask 1043456   ;;  %v996_v55 = vmov 0  }
  0x37   : > { %v1149_v6 = vld [vmem:[%s216_s28 + $0x58] sm:$0xff]  ;;  %v1153_v8 = vld [vmem:[%s216_s28 + $0x40] sm:$0xff]  ;;  %v1155_v9 = vld [vmem:[%s216_s28 + $0x48] sm:$0xff]  ;;  %v277_v10 = vadd.f32 %v1145_v4, %v1141_v2  ;;  %864 = vset.pattern.permute.xlu1 %v996_v55  ;;  %863 = vset.pattern.permute.xlu0 %v996_v55  ;;  %s1251_s10 = scalar_lea.vmem [#allocation5], %s732_s25  ;;  %s758_s25 = sshll.u32 %s1051_s22, 11 }
  0x38   : > { %v274_v7 = vadd.f32 %v1149_v6, %v1147_v5  ;;  %281 = vadd.xlane.f32.xlu0 %v280_v3  ;;  %v271_v11 = vadd.f32 %v1155_v9, %v1153_v8  ;;  %v1161_v12 = vld [vmem:[%s216_s28 + $0x30] sm:$0xff]  ;;  %v1163_v13 = vld [vmem:[%s216_s28 + $0x38] sm:$0xff]  ;;  %v1165_v14 = vld [vmem:[%s216_s28 + $0x20] sm:$0xff]  ;;  %s652_s11 = sshll.u32 %s1251_s10, 4  ;;  %s1284_s26 = scalar_lea.hbm %s1338_s5, %s758_s25  ;;  %s1286_s11 = int_to_ptr.vmem [resolvable:$true] %s652_s11 }
  0x39   : > { %v1167_v15 = vld [vmem:[%s216_s28 + $0x28] sm:$0xff]  ;;  %v268_v16 = vadd.f32 %v1163_v13, %v1161_v12  ;;  %v1173_v18 = vld [vmem:[%s216_s28 + $0x10] sm:$0xff]  ;;  %v1175_v19 = vld [vmem:[%s216_s28 + $0x18] sm:$0xff]  ;;  %s639_s22 = scalar_lea.sflag [#allocation4], %s1127_s23  ;;  %p1347_p12 = scmp.ne.s32.totalorder %s1343_s30, 0 }
  0x3a   : > { %275 = vadd.xlane.f32.xlu1 %v274_v7  ;;  %v265_v17 = vadd.f32 %v1167_v15, %v1165_v14  ;;  %v1177_v20 = vld [vmem:[%s216_s28] sm:$0xff]  ;;  %v1179_v21 = vld [vmem:[%s216_s28 + $0x8] sm:$0xff]  ;;  %v262_v22 = vadd.f32 %v1175_v19, %v1173_v18  ;;  %v370_v49 = vld [vmem:[%s1336_s3 + $0x10] sm:$0xff]  ;;  %s925_s28 = scalar_lea.vmem %s1286_s11, 2048  ;;  %s997_s29 = smov [#allocation5]  }
  0x3b   : > { %v259_v23 = vadd.f32 %v1179_v21, %v1177_v20  ;;  %v291_v41 = vld [vmem:[%s1334_s1] sm:$0xf]  ;;  %v369_v48 = vld [vmem:[%s1336_s3 + $0x8] sm:$0xff]  ;;  %v371_v50 = vld [vmem:[%s1336_s3 + $0x18] sm:$0xff]  ;;  %p926_p11 = scmp.ne.s32.totalorder %s1286_s11, %s925_s28  ;;  %s929_s12 = sshll.u32 %s997_s29, 4  ;;  %s930_s12 = int_to_ptr.vmem [resolvable:$false] %s929_s12 }
  0x3c   : > { %278 = vadd.xlane.f32.xlu0 %v277_v10  ;;  %v368_v42 = vld [vmem:[%s1336_s3] sm:$0xff]  ;;  %v373_v52 = vld [vmem:[%s1336_s3 + $0x28] sm:$0xff]  ;;  %v374_v53 = vld [vmem:[%s1336_s3 + $0x30] sm:$0xff]  ;;  %s931_s14 = scalar_lea.vmem %s930_s12, 4096  ;;  %p932_p5 = scmp.lt.s32.totalorder %s1286_s11, %s930_s12 }
  0x3d   : > { %798 = vmatprep.mubr.msk.f32.mxu1 %vm384_vm2, %v368_v42  ;;  %v292_v43 = vld [vmem:[%s1335_s2] sm:$0xf]  ;;  %v375_v54 = vld [vmem:[%s1336_s3 + $0x38] sm:$0xff]  ;;  %v377_v56 = vld [vmem:[%s1337_s4 + $0x8] sm:$0xff]  ;;  %p927_p13 = pnand %p926_p11, %p1347_p12  ;;  %p933_p7 = scmp.lt.s32.totalorder %s931_s14, %s925_s28 }
  0x3e   : > { %272 = vadd.xlane.f32.xlu1 %v271_v11  ;;  %v372_v51 = vld [vmem:[%s1336_s3 + $0x20] sm:$0xff]  ;;  %v379_v61 = vld [vmem:[%s1337_s4 + $0x18] sm:$0xff]  ;;  %v378_v7 = vld [vmem:[%s1337_s4 + $0x10] sm:$0xff] }
  0x3f   : > { %v376_v58 = vld [vmem:[%s1337_s4] sm:$0xff]  ;;  %p928_p4 = pneg %p927_p13  ;;  %p934_p8 = por %p933_p7, %p932_p5 }
  0x40   : > { %269 = vadd.xlane.f32.xlu0 %v268_v16 }
  0x41   : > { %p935_p10 = pnand %p934_p8, %p928_p4 }
  0x42   : > { %266 = vadd.xlane.f32.xlu1 %v265_v17  ;;  %v381_v17 = vld [vmem:[%s1337_s4 + $0x28] sm:$0xff] }
  0x44   : > { %263 = vadd.xlane.f32.xlu0 %v262_v22 }
  0x46   : > { %260 = vadd.xlane.f32.xlu1 %v259_v23 }
  0xc1   : > { %v282_v25 = vpop.xlane.xlu0 %281 }
  0xc2   : > { %v290_v26 = vmul.f32 0.00390625, %v282_v25  ;;  %v380_v25 = vld [vmem:[%s1337_s4 + $0x20] sm:$0xff] }
  0xc3   : > { %v276_v27 = vpop.xlane.xlu1 %275 }
  0xc4   : > { %778 = vmatpush3.msra.mxu0 %v290_v26  ;;  %v288_v31 = vmul.f32 0.00390625, %v276_v27 }
  0xc5   : > { %v279_v28 = vpop.xlane.xlu0 %278  ;;  %779 = vmatprep.subr.mxu0 %v994_v24 }
  0xc6   : > { %v289_v29 = vmul.f32 0.00390625, %v279_v28 }
  0xc7   : > { %v273_v30 = vpop.xlane.xlu1 %272 }
  0xc8   : > { %780 = vmatpush3.msra.mxu0 %v289_v29  ;;  %v287_v32 = vmul.f32 0.00390625, %v273_v30 }
  0xc9   : > { %781 = vmatprep.subr.mxu0 %v994_v24  ;;  %v270_v33 = vpop.xlane.xlu0 %269 }
  0xca   : > { %782 = vmatpush3.msra.mxu0 %v288_v31  ;;  %v286_v34 = vmul.f32 0.00390625, %v270_v33 }
  0xcb   : > { %v267_v35 = vpop.xlane.xlu1 %266  ;;  %783 = vmatprep.subr.mxu0 %v994_v24 }
  0xcc   : > { %784 = vmatpush3.msra.mxu0 %v287_v32  ;;  %v285_v36 = vmul.f32 0.00390625, %v267_v35  ;;  %v382_v32 = vld [vmem:[%s1337_s4 + $0x30] sm:$0xff] }
  0xcd   : > { %785 = vmatprep.subr.mxu0 %v994_v24  ;;  %v264_v37 = vpop.xlane.xlu0 %263 }
  0xce   : > { %786 = vmatpush3.msra.mxu0 %v286_v34  ;;  %v284_v38 = vmul.f32 0.00390625, %v264_v37  ;;  %v383_v34 = vld [vmem:[%s1337_s4 + $0x38] sm:$0xff] }
  0xcf   : > { %v261_v39 = vpop.xlane.xlu1 %260  ;;  %787 = vmatprep.subr.mxu0 %v994_v24 }
  0xd0   : > { %788 = vmatpush3.msra.mxu0 %v285_v36  ;;  %v283_v40 = vmul.f32 0.00390625, %v261_v39 }
  0xd1   : > { %789 = vmatprep.subr.mxu0 %v994_v24 }
  0xd2   : > { %790 = vmatpush3.msra.mxu0 %v284_v38 }
  0xd3   : > { %791 = vmatprep.subr.mxu0 %v994_v24 }
  0xd4   : > { %792 = vmatpush3.msra.mxu0 %v283_v40 }
  0xd5   : > { %794 = vmatmul.mubr.msk.f32.vlgmr.msra.gmra.mxu0 %vm293_vm1, %v291_v41 }
 0x195   : > { %v363_v44 = vpop.f32.mrf.mxu0 }
 0x196   : > { %v364_v45 = vadd.f32 %v363_v44, %v292_v43 }
 0x197   : > { %v795_v46 = vpop.f32.mrf.mxu0 }
 0x198   : > { %v367_v47 = vmax.f32 %v364_v45, 0.0 }
 0x19a   : > { %796 = vmatprep.subr.msk.mxu1 %vm409_vm3, %v367_v47 }
 0x19b   : > { %797 = vmatpush3.msk.msra.mxu1 %vm409_vm3, %v367_v47 }
 0x19c   : > { %799 = vmatmul.mubr.msk.f32.vlgmr.msra.gmra.mxu1 %vm384_vm2, %v369_v48 }
 0x19d   : > { %801 = vmatprep.mubr.msk.f32.mxu1 %vm384_vm2, %v370_v49 }
 0x1a0   : > { %802 = vmatmul.mubr.msk.f32.gmra.mxu1 %vm384_vm2, %v371_v50 }
 0x1a1   : > { %804 = vmatprep.mubr.msk.f32.mxu1 %vm384_vm2, %v372_v51 }
 0x1a4   : > { %805 = vmatmul.mubr.msk.f32.gmra.mxu1 %vm384_vm2, %v373_v52 }
 0x1a5   : > { %807 = vmatprep.mubr.msk.f32.mxu1 %vm384_vm2, %v374_v53 }
 0x1a8   : > { %808 = vmatmul.mubr.msk.f32.gmra.mxu1 %vm384_vm2, %v375_v54 }
 0x25c   : > { %v800_v57 = vpop.f32.mrf.mxu1 }
 0x25d   : > { %v485_v59 = vadd.f32 %v800_v57, %v377_v56 }
 0x25e   : > { %v479_v60 = vpop.f32.mrf.mxu1 }
 0x25f   : > { %v745_v62 = vmul.f32 -1.442695, %v485_v59  ;;  %v480_v63 = vadd.f32 %v479_v60, %v376_v58 }
 0x260   : > { %v803_v3 = vpop.f32.mrf.mxu1 }
 0x261   : > { %865 = vpow2.f32 %v745_v62  ;;  %v744_v10 = vmul.f32 -1.442695, %v480_v63  ;;  %v495_v11 = vadd.f32 %v803_v3, %v379_v61 }
 0x262   : > { %v489_v16 = vpop.f32.mrf.mxu1 }
 0x263   : > { %867 = vpow2.f32 %v744_v10  ;;  %v747_v22 = vmul.f32 -1.442695, %v495_v11  ;;  %v490_v23 = vadd.f32 %v489_v16, %v378_v7 }
 0x264   : > { %v806_v24 = vpop.f32.mrf.mxu1 }
 0x265   : > { %869 = vpow2.f32 %v747_v22  ;;  %v746_v26 = vmul.f32 -1.442695, %v490_v23  ;;  %v505_v27 = vadd.f32 %v806_v24, %v381_v17 }
 0x266   : > { %v499_v28 = vpop.f32.mrf.mxu1 }
 0x267   : > { %871 = vpow2.f32 %v746_v26  ;;  %v749_v29 = vmul.f32 -1.442695, %v505_v27  ;;  %v500_v30 = vadd.f32 %v499_v28, %v380_v25 }
 0x268   : > { %v809_v31 = vpop.f32.mrf.mxu1 }
 0x269   : > { %873 = vpow2.f32 %v749_v29  ;;  %v748_v33 = vmul.f32 -1.442695, %v500_v30  ;;  %v515_v37 = vadd.f32 %v809_v31, %v383_v34 }
 0x26a   : > { %v509_v35 = vpop.f32.mrf.mxu1 }
 0x26b   : > { %v510_v36 = vadd.f32 %v509_v35, %v382_v32  ;;  %875 = vpow2.f32 %v748_v33  ;;  %v751_v42 = vmul.f32 -1.442695, %v515_v37 }
 0x26d   : > { %v750_v38 = vmul.f32 -1.442695, %v510_v36 }
 0x26e   : > { %v866_v39 = vpop.eup %865 }
 0x26f   : > { %v543_v40 = vadd.f32 1.0, %v866_v39  ;;  %877 = vpow2.f32 %v750_v38 }
 0x270   : > { %v868_v41 = vpop.eup %867 }
 0x271   : > { %879 = vrcp.f32 %v543_v40  ;;  %v542_v43 = vadd.f32 1.0, %v868_v41 }
 0x272   : > { %v870_v44 = vpop.eup %869 }
 0x273   : > { %881 = vrcp.f32 %v542_v43  ;;  %v545_v45 = vadd.f32 1.0, %v870_v44 }
 0x274   : > { %v872_v46 = vpop.eup %871  ;;  %883 = vpow2.f32 %v751_v42 }
 0x275   : > { %885 = vrcp.f32 %v545_v45  ;;  %v544_v47 = vadd.f32 1.0, %v872_v46 }
 0x276   : > { %v874_v48 = vpop.eup %873 }
 0x277   : > { %v547_v49 = vadd.f32 1.0, %v874_v48  ;;  %887 = vrcp.f32 %v544_v47 }
 0x278   : > { %v876_v50 = vpop.eup %875 }
 0x279   : > { %889 = vrcp.f32 %v547_v49  ;;  %v546_v52 = vadd.f32 1.0, %v876_v50 }
 0x27b   : > { %891 = vrcp.f32 %v546_v52 }
 0x27c   : > { %v878_v51 = vpop.eup %877 }
 0x27d   : > { %v548_v56 = vadd.f32 1.0, %v878_v51 }
 0x27e   : > { %v880_v53 = vpop.eup %879 }
 0x27f   : > { %573 = vperm.xlu1 %864, %v880_v53   ;;  %893 = vrcp.f32 %v548_v56 }
 0x280   : > { %v882_v54 = vpop.eup %881 }
 0x281   : > { %v884_v55 = vpop.eup %883  ;;  %568 = vperm.xlu0 %863, %v882_v54  }
 0x282   : > { %v886_v57 = vpop.eup %885  ;;  %v549_v58 = vadd.f32 1.0, %v884_v55 }
 0x283   : > { %583 = vperm.xlu1 %864, %v886_v57  }
 0x284   : > { %v888_v59 = vpop.eup %887  ;;  %895 = vrcp.f32 %v549_v58 }
 0x286   : > { %v890_v60 = vpop.eup %889 }
 0x287   : > { %578 = vperm.xlu1 %864, %v888_v59  }
 0x288   : > { %v892_v61 = vpop.eup %891 }
 0x28b   : > { %593 = vperm.xlu1 %864, %v890_v60  }
 0x28c   : > { %v894_v62 = vpop.eup %893 }
 0x28f   : > { %588 = vperm.xlu1 %864, %v892_v61  }
 0x291   : > { %v896_v63 = vpop.eup %895 }
 0x293   : > { %598 = vperm.xlu1 %864, %v894_v62  }
 0x297   : > { %603 = vperm.xlu1 %864, %v896_v63  }
 0x2fa   : > { %v574_v3 = vpop.permute.xlu1 %573 }
 0x2fb   : > { %v608_v7 = vmul.f32 %v574_v3, %v1173_v18  ;;  %v609_v10 = vmul.f32 %v574_v3, %v1175_v19 }
 0x2fc   : > { %v569_v11 = vpop.permute.xlu0 %568 }
 0x2fd   : > { %624 = vst [vmem:[%s1251_s10 + $0x10] sm:$0xff] %v608_v7  ;;  %625 = vst [vmem:[%s1251_s10 + $0x18] sm:$0xff] %v609_v10  ;;  %v606_v16 = vmul.f32 %v569_v11, %v1177_v20  ;;  %v607_v18 = vmul.f32 %v569_v11, %v1179_v21 }
 0x2fe   : > { %v584_v19 = vpop.permute.xlu1 %583 }
 0x2ff   : > { %622 = vst [vmem:[%s1251_s10] sm:$0xff] %v606_v16  ;;  %623 = vst [vmem:[%s1251_s10 + $0x8] sm:$0xff] %v607_v18  ;;  %v612_v17 = vmul.f32 %v584_v19, %v1161_v12  ;;  %v613_v22 = vmul.f32 %v584_v19, %v1163_v13 }
 0x301   : > { %628 = vst [vmem:[%s1251_s10 + $0x30] sm:$0xff] %v612_v17  ;;  %629 = vst [vmem:[%s1251_s10 + $0x38] sm:$0xff] %v613_v22 }
 0x302   : > { %v579_v23 = vpop.permute.xlu1 %578 }
 0x303   : > { %v610_v24 = vmul.f32 %v579_v23, %v1165_v14  ;;  %v611_v20 = vmul.f32 %v579_v23, %v1167_v15 }
 0x305   : > { %626 = vst [vmem:[%s1251_s10 + $0x20] sm:$0xff] %v610_v24  ;;  %627 = vst [vmem:[%s1251_s10 + $0x28] sm:$0xff] %v611_v20 }
 0x306   : > { %v594_v21 = vpop.permute.xlu1 %593 }
 0x307   : > { %v616_v12 = vmul.f32 %v594_v21, %v1147_v5  ;;  %v617_v13 = vmul.f32 %v594_v21, %v1149_v6 }
 0x309   : > { %632 = vst [vmem:[%s1251_s10 + $0x50] sm:$0xff] %v616_v12  ;;  %633 = vst [vmem:[%s1251_s10 + $0x58] sm:$0xff] %v617_v13 }
 0x30a   : > { %v589_v25 = vpop.permute.xlu1 %588 }
 0x30b   : > { %v614_v26 = vmul.f32 %v589_v25, %v1153_v8  ;;  %v615_v14 = vmul.f32 %v589_v25, %v1155_v9 }
 0x30d   : > { %630 = vst [vmem:[%s1251_s10 + $0x40] sm:$0xff] %v614_v26  ;;  %631 = vst [vmem:[%s1251_s10 + $0x48] sm:$0xff] %v615_v14 }
 0x30e   : > { %v599_v15 = vpop.permute.xlu1 %598 }
 0x30f   : > { %v618_v27 = vmul.f32 %v599_v15, %v1141_v2  ;;  %v619_v5 = vmul.f32 %v599_v15, %v1145_v4 }
 0x311   : > { %634 = vst [vmem:[%s1251_s10 + $0x60] sm:$0xff] %v618_v27  ;;  %635 = vst [vmem:[%s1251_s10 + $0x68] sm:$0xff] %v619_v5 }
 0x312   : > { %v604_v6 = vpop.permute.xlu1 %603 }
 0x313   : > { %v620_v2 = vmul.f32 %v604_v6, %v1137_v0  ;;  %v621_v8 = vmul.f32 %v604_v6, %v1139_v1 }
 0x315   : > { %636 = vst [vmem:[%s1251_s10 + $0x70] sm:$0xff] %v620_v2  ;;  %637 = vst [vmem:[%s1251_s10 + $0x78] sm:$0xff] %v621_v8 }
 0x316   : > { %938 = shalt.err (!%p935_p10)
}
 0x317   : > { %s939_s15 = scalar_lea.hbm %s1284_s26, 2048  ;;  %s943_s7 = scalar_lea.hbm %s1338_s5, 4096 }
 0x318   : > { %p940_p0 = scmp.ne.s32.totalorder %s1284_s26, %s939_s15  ;;  %p944_p1 = scmp.lt.s32.totalorder %s1284_s26, %s1338_s5 }
 0x319   : > { %p945_p3 = scmp.lt.s32.totalorder %s943_s7, %s939_s15 }
 0x31a   : > { %p941_p2 = pnand %p940_p0, %p1347_p12 }
 0x31b   : > { %p946_p6 = por %p945_p3, %p944_p1 }
 0x31c   : > { %p942_p9 = pneg %p941_p2 }
 0x31e   : > { %p947_p11 = pnand %p946_p6, %p942_p9 }
 0x320   : > { %950 = shalt.err (!%p947_p11)
}
 0x321   : > { %s998_s25 = smov 256   ;;  %s999_s13 = smov 16  }
 0x322   : > { %812 = dma.vmem_to_hbm [thread:$0]  (%p1347_p12), %s1286_s11, 2048, %s1284_s26, %s639_s22, %s998_s25, %s998_s25, %s999_s13  }
 0x323 PF: > { %s667_s17 = sand.u32 1, %s977_s18   ;;  %p1348_p13 = scmp.ne.s32.totalorder %s1344_s6, 0 }
 0x324   : > { %p1349_p4 = scmp.ge.s32.totalorder %s989_s21, 2  ;;  %s668_s28 = scalar_lea.sflag [#allocation4], %s667_s17 }
 0x326   : > { %p819_p5 = pnand %p1349_p4, %p1348_p13 }
 0x328   : > { %p820_p7 = pneg %p819_p5 }
 0x32a   : > { %972 = dma.done.wait (%p820_p7), %s668_s28, 2048  }
 0x32b   : > { %974 = vsyncadd (%p820_p7), %s668_s28, 4294965248  ;;  %p18_p8 = scmp.ge.s32.totalorder %s1055_s24, 4   ;;  %s1350_s18 = smov %s981_s19 }
 0x32c   : > { %s1351_s19 = smov %s985_s20  ;;  %s1352_s20 = smov %s1067_s27 }
 0x32d   : > { %s1353_s21 = smov %s1055_s24  ;;  %20 = sbr.rel (!%p18_p8) target bundleno = 5 (0x5), region = 85 }
 0x332   :  { %673 = vsyncpa [#allocation3], 1 }
 0x333   :  { %675 = vsyncpa [#allocation3 + $0x1], 1 }
 0x334   :  { %676 = vsyncpa [#allocation4], 1 }
 0x335   :  { %678 = vsyncpa [#allocation4 + $0x1], 1 }

</bundles_post_ra>
